<compile_context>
chip_gen: v6e
topology: v6e:2x2x1
jax: 0.10.0
libtpu: 0.0.40
codegen_flags: <defaults>
</compile_context>

<pallas_src>
import functools

import jax
import jax.numpy as jnp
from jax import lax
from jax.experimental import pallas as pl
from jax.experimental.pallas import tpu as pltpu


# ----------------------------- parameter init -------------------------------
def _orthogonal(key, rows, cols, dtype=jnp.float32):
    """Deterministic orthogonal init (same recipe as torch.nn.init.orthogonal_)."""
    transposed = rows < cols
    shape = (cols, rows) if transposed else (rows, cols)
    a = jax.random.normal(key, shape, dtype)
    q, r = jnp.linalg.qr(a)
    q = q * jnp.sign(jnp.diag(r))[None, :]
    if transposed:
        q = q.T
    return q[:rows, :cols]


def he_kaiming_init(key, out_channels, in_channels, dtype=jnp.float32):
    """orthogonal -> row-standardize -> scale by sqrt(1/fan_in)."""
    w = _orthogonal(key, out_channels, in_channels, dtype)
    mean = jnp.mean(w, axis=1, keepdims=True)
    var = jnp.var(w, axis=1, keepdims=True)
    w = (w - mean) / jnp.sqrt(var + 1e-12)
    fan_in = in_channels
    return w * (1.0 / fan_in) ** 0.5


# ------------------------------ small helpers --------------------------------
def _round_up(x, m):
    return ((x + m - 1) // m) * m


def _apply_activation(x, activation):
    if activation is None:
        return x
    a = activation.lower()
    if a == "relu":
        return jnp.maximum(x, 0.0)
    if a == "elu":
        return jnp.where(x > 0, x, jnp.expm1(x))
    if a == "silu":
        return x * jax.nn.sigmoid(x)
    raise ValueError(f"unknown activation {activation!r}")


# Contract last axis of x (K) with last axis of W (K): no transpose needed.
_CONTRACT_LAST = (((1,), (1,)), ((), ()))


# ------------------------------- Pallas kernels -------------------------------
def _single_block_kernel(x_ref, w_ref, b_ref, o_ref, *, activation):
    # x_ref: (Np, Kp), w_ref: (Op, Kp), b_ref: (1, Op), o_ref: (Np, Op)
    acc = lax.dot_general(
        x_ref[...], w_ref[...],
        dimension_numbers=_CONTRACT_LAST,
        preferred_element_type=jnp.float32,
    )
    acc = acc + b_ref[...].astype(jnp.float32)
    o_ref[...] = _apply_activation(acc, activation).astype(o_ref.dtype)


def _tiled_kernel(x_ref, w_ref, b_ref, o_ref, acc_ref, *, activation):
    # x_ref: (tm, tk), w_ref: (tn, tk), b_ref: (1, tn), o_ref: (tm, tn)
    k = pl.program_id(2)

    @pl.when(k == 0)
    def _():
        acc_ref[...] = jnp.zeros_like(acc_ref)

    acc_ref[...] += lax.dot_general(
        x_ref[...], w_ref[...],
        dimension_numbers=_CONTRACT_LAST,
        preferred_element_type=jnp.float32,
    )

    @pl.when(k == pl.num_programs(2) - 1)
    def _():
        acc = acc_ref[...] + b_ref[...].astype(jnp.float32)
        o_ref[...] = _apply_activation(acc, activation).astype(o_ref.dtype)


# --------------------------------- wrapper ------------------------------------
def linear_layer(x, weight, bias=None, activation=None, *,
                 tm=256, tn=256, tk=512, compute_dtype=None):
    """Fused Linear(+bias)(+activation) forward.

    x:      (N, in_channels)
    weight: (out_channels, in_channels)
    bias:   (out_channels,) or None
    compute_dtype: e.g. jnp.bfloat16 on v6e/v7x for MXU peak (f32 accumulation).
    """
    N, K = x.shape
    O, K2 = weight.shape
    assert K == K2, "in_channels mismatch"

    out_dtype = x.dtype
    if compute_dtype is not None:
        x = x.astype(compute_dtype)
        weight = weight.astype(compute_dtype)

    # Tile sizes clamped to the (8,128)-aligned problem size; pad arrays so the
    # grid divides evenly and every block is lane/sublane dense.
    tk = min(tk, _round_up(K, 128))
    tn = min(tn, _round_up(O, 128))
    tm = min(tm, _round_up(N, 8))
    Kp = _round_up(K, tk)
    Op = _round_up(O, tn)
    Np = _round_up(N, tm)

    xp = jnp.pad(x, ((0, Np - N), (0, Kp - K))) if (Np, Kp) != (N, K) else x
    wp = jnp.pad(weight, ((0, Op - O), (0, Kp - K))) if (Op, Kp) != (O, K) else weight
    if bias is None:
        bp = jnp.zeros((1, Op), dtype=jnp.float32)
    else:
        bp = jnp.pad(bias.astype(jnp.float32), (0, Op - O)).reshape(1, Op)

    grid = (Np // tm, Op // tn, Kp // tk)

    if grid == (1, 1, 1):
        # Tiny problem: one invocation, whole (padded) arrays as single blocks,
        # no accumulator scratch, no grid-step overhead.
        out_p = pl.pallas_call(
            functools.partial(_single_block_kernel, activation=activation),
            out_shape=jax.ShapeDtypeStruct((Np, Op), out_dtype),
            grid_spec=pltpu.PrefetchScalarGridSpec(
                num_scalar_prefetch=0,
                grid=(1,),
                in_specs=[
                    pl.BlockSpec((Np, Kp), lambda i: (0, 0)),
                    pl.BlockSpec((Op, Kp), lambda i: (0, 0)),
                    pl.BlockSpec((1, Op), lambda i: (0, 0)),
                ],
                out_specs=pl.BlockSpec((Np, Op), lambda i: (0, 0)),
            ),
            compiler_params=pltpu.CompilerParams(
                dimension_semantics=("arbitrary",),
            ),
        )(xp, wp, bp)
    else:
        out_p = pl.pallas_call(
            functools.partial(_tiled_kernel, activation=activation),
            out_shape=jax.ShapeDtypeStruct((Np, Op), out_dtype),
            grid_spec=pltpu.PrefetchScalarGridSpec(
                num_scalar_prefetch=0,
                grid=grid,
                in_specs=[
                    pl.BlockSpec((tm, tk), lambda i, j, k: (i, k)),
                    pl.BlockSpec((tn, tk), lambda i, j, k: (j, k)),
                    pl.BlockSpec((1, tn), lambda i, j, k: (0, j)),
                ],
                out_specs=pl.BlockSpec((tm, tn), lambda i, j, k: (i, j)),
                scratch_shapes=[pltpu.VMEM((tm, tn), jnp.float32)],
            ),
            compiler_params=pltpu.CompilerParams(
                dimension_semantics=("parallel", "parallel", "arbitrary"),
                vmem_limit_bytes=48 * 1024 * 1024,
            ),
        )(xp, wp, bp)

    if (Np, Op) != (N, O):
        out_p = out_p[:N, :O]
    return out_p


# ------------------------------------ main -----------------------------------
if __name__ == "__main__":
    key = jax.random.PRNGKey(0)
    k_w, k_x, k_w2, k_x2, k_b2 = jax.random.split(key, 5)

    # ---- 1) module-default config: LinearLayer(32, 48, bias=False, 'relu') ----
    in_channels, out_channels, N = 32, 48, 64
    weight = he_kaiming_init(k_w, out_channels, in_channels)          # (O, K)
    x = jax.random.normal(k_x, (N, in_channels), jnp.float32)

    out = linear_layer(x, weight, bias=None, activation="relu")
    out = jax.block_until_ready(out)
    ref = jnp.maximum(x @ weight.T, 0.0)
    assert out.shape == (N, out_channels)
    assert jnp.allclose(out, ref, atol=1e-4, rtol=1e-4)

    # ---- 2) tiled path (exercises K/O/N tiling, padding, bias, silu) ----------
    N2, K2, O2 = 200, 300, 200
    weight2 = he_kaiming_init(k_w2, O2, K2)
    bias2 = 0.1 * jax.random.normal(k_b2, (O2,), jnp.float32)
    x2 = jax.random.normal(k_x2, (N2, K2), jnp.float32)

    out2 = linear_layer(x2, weight2, bias=bias2, activation="silu",
                        tm=128, tn=128, tk=256)
    out2 = jax.block_until_ready(out2)
    lin2 = x2 @ weight2.T + bias2[None, :]
    ref2 = lin2 * jax.nn.sigmoid(lin2)
    assert out2.shape == (N2, O2)
    assert jnp.allclose(out2, ref2, atol=2e-2, rtol=2e-2)

    print("KERNEL_OK")
</pallas_src>

<mosaic_0001>
module attributes {stable_mosaic.version = 11 : i64} {
  func.func @_single_block_kernel(%arg0: i32, %arg1: memref<64x128xf32, #tpu.memory_space<vmem>>, %arg2: memref<128x128xf32, #tpu.memory_space<vmem>>, %arg3: memref<1x128xf32, #tpu.memory_space<vmem>>, %arg4: memref<64x128xf32, #tpu.memory_space<vmem>>) attributes {dimension_semantics = [#tpu.dimension_semantics<arbitrary>], iteration_bounds = array<i64: 1>, scalar_prefetch = 0 : i64, scratch_operands = 0 : i64, tpu.core_type = #tpu.core_type<tc>, window_params = [{pipeline_mode = #tpu.pipeline_mode<synchronous>, transform_indices = @transform_0, window_bounds = array<i64: 64, 128>}, {pipeline_mode = #tpu.pipeline_mode<synchronous>, transform_indices = @transform_1, window_bounds = array<i64: 128, 128>}, {pipeline_mode = #tpu.pipeline_mode<synchronous>, transform_indices = @transform_2, window_bounds = array<i64: 1, 128>}, {pipeline_mode = #tpu.pipeline_mode<synchronous>, transform_indices = @transform_3, window_bounds = array<i64: 64, 128>}]} {
    %c0 = arith.constant 0 : index
    %c0_0 = arith.constant 0 : index
    %0 = vector.load %arg1[%c0, %c0_0] : memref<64x128xf32, #tpu.memory_space<vmem>>, vector<64x128xf32>
    %c0_1 = arith.constant 0 : index
    %c0_2 = arith.constant 0 : index
    %1 = vector.load %arg2[%c0_1, %c0_2] : memref<128x128xf32, #tpu.memory_space<vmem>>, vector<128x128xf32>
    %cst = arith.constant dense<0.000000e+00> : vector<64x128xf32>
    %2 = tpu.matmul %0, %1, %cst {dimension_numbers = #tpu.dot_dimension_numbers<[1], [1], [0], [0], [0, 0, 1, 0], [], []>} : vector<64x128xf32>, vector<128x128xf32>, vector<64x128xf32> -> vector<64x128xf32>
    %c0_3 = arith.constant 0 : index
    %c0_4 = arith.constant 0 : index
    %3 = vector.load %arg3[%c0_3, %c0_4] : memref<1x128xf32, #tpu.memory_space<vmem>>, vector<1x128xf32>
    %4 = vector.broadcast %3 : vector<1x128xf32> to vector<64x128xf32>
    %5 = arith.addf %2, %4 : vector<64x128xf32>
    %cst_5 = arith.constant 0.000000e+00 : f32
    %6 = vector.broadcast %cst_5 : f32 to vector<64x128xf32>
    %7 = arith.maximumf %5, %6 : vector<64x128xf32>
    %c0_6 = arith.constant 0 : index
    %c0_7 = arith.constant 0 : index
    %8 = vector.load %arg4[%c0_6, %c0_7] : memref<64x128xf32, #tpu.memory_space<vmem>>, vector<64x128xf32>
    tpu.vector_store %arg4[%c0_6, %c0_7], %7 {strides = array<i32>} : memref<64x128xf32, #tpu.memory_space<vmem>>, vector<64x128xf32>,
    return
  }
  func.func @transform_0(%arg0: i32) -> (i32, i32) {
    %c0_i32 = arith.constant 0 : i32
    %c0_i32_0 = arith.constant 0 : i32
    %c0_i32_1 = arith.constant 0 : i32
    return %c0_i32, %c0_i32_0 : i32, i32
  }
  func.func @transform_1(%arg0: i32) -> (i32, i32) {
    %c0_i32 = arith.constant 0 : i32
    %c0_i32_0 = arith.constant 0 : i32
    %c0_i32_1 = arith.constant 0 : i32
    return %c0_i32, %c0_i32_0 : i32, i32
  }
  func.func @transform_2(%arg0: i32) -> (i32, i32) {
    %c0_i32 = arith.constant 0 : i32
    %c0_i32_0 = arith.constant 0 : i32
    %c0_i32_1 = arith.constant 0 : i32
    return %c0_i32, %c0_i32_0 : i32, i32
  }
  func.func @transform_3(%arg0: i32) -> (i32, i32) {
    %c0_i32 = arith.constant 0 : i32
    %c0_i32_0 = arith.constant 0 : i32
    %c0_i32_1 = arith.constant 0 : i32
    return %c0_i32, %c0_i32_0 : i32, i32
  }
}

</mosaic_0001>

<bundles_post_ra>
// kernel: tpu_custom_call.1
= control target key start
LH: loop header
LB: loop body
LE: loop exit
PB: predicated region body
PF: predicated region fallthrough
CT: control target
= control target key end

     0   :  { %8 = vsyncpa [#allocation3], 0  ;;  %s431_s0 = inlined_call_operand.hbm [shape: f32[64,128], index: 0, kind: input, shape index: {}]   ;;  %s432_s1 = inlined_call_operand.hbm [shape: f32[128,128], index: 1, kind: input, shape index: {}]   ;;  %s433_s2 = inlined_call_operand.vmem [shape: f32[1,128], index: 2, kind: input, shape index: {}]   ;;  %s434_s3 = inlined_call_operand.hbm [shape: f32[64,128], index: 3, kind: output, shape index: {}]  }
   0x1   :  { %9 = vsyncpa [#allocation6], 0 }
   0x2   :  { %10 = vsyncpa [#allocation4], 0  ;;  %s385_s12 = smov [#allocation2]  }
   0x3   :  { %s16_s13 = sshll.u32 %s385_s12, 4  ;;  %s17_s13 = int_to_ptr.vmem [resolvable:$true] %s16_s13 }
   0x4   :  { %s327_s14 = scalar_lea.vmem %s17_s13, 1024  ;;  %p332_p1 = scmp.lt.s32.totalorder %s17_s13, %s17_s13 }
   0x5   :  { %p328_p0 = scmp.ne.s32.totalorder %s17_s13, %s327_s14  ;;  %p333_p2 = scmp.lt.s32.totalorder %s327_s14, %s327_s14 }
   0x7   :  { %p334_p3 = por %p333_p2, %p332_p1 }
   0x9   :  { %p335_p4 = pnand %p334_p3, %p328_p0 }
   0xb   :  { %338 = shalt.err (!%p335_p4)
}
   0xc   :  { %s386_s15 = smov 128   ;;  %s387_s16 = smov 8  }
   0xd   :  { %22 = dma.hbm_to_vmem [thread:$0]  %s431_s0, 1024, %s17_s13, [#allocation3], %s386_s15, %s386_s15, %s387_s16  }
   0xe   :  { %s388_s19 = smov [#allocation5]  }
   0xf   :  { %s28_s20 = sshll.u32 %s388_s19, 4  ;;  %s29_s20 = int_to_ptr.vmem [resolvable:$true] %s28_s20 }
  0x10   :  { %s347_s21 = scalar_lea.vmem %s29_s20, 2048  ;;  %p352_p6 = scmp.lt.s32.totalorder %s29_s20, %s29_s20 }
  0x11   :  { %p348_p5 = scmp.ne.s32.totalorder %s29_s20, %s347_s21  ;;  %p353_p7 = scmp.lt.s32.totalorder %s347_s21, %s347_s21 }
  0x13   :  { %p354_p8 = por %p353_p7, %p352_p6 }
  0x15   :  { %p355_p9 = pnand %p354_p8, %p348_p5 }
  0x17   :  { %358 = shalt.err (!%p355_p9)
}
  0x18   :  { %34 = dma.hbm_to_vmem [thread:$0]  %s432_s1, 2048, %s29_s20, [#allocation6], %s386_s15, %s386_s15, %s387_s16  }
  0x19   :  { %379 = dma.done.wait [#allocation3], 1024  }
  0x1a   :  { %380 = vsyncadd [#allocation3], 4294966272 }
  0x1b   :  { %381 = dma.done.wait [#allocation6], 2048  }
  0x1c   :  { %382 = vsyncadd [#allocation6], 4294965248  ;;  %v66_v0 = vld [vmem:[#allocation5 + $0x78] sm:$0xff]  ;;  %v65_v1 = vld [vmem:[#allocation5 + $0x70] sm:$0xff] }
  0x1d   :  { %238 = vmatprep.subr.mxu0 %v66_v0  ;;  %282 = vmatprep.subr.mxu1 %v66_v0  ;;  %v64_v2 = vld [vmem:[#allocation5 + $0x68] sm:$0xff]  ;;  %v43_v3 = vld [vmem:[#allocation2] sm:$0xff]  ;;  %v62_v6 = vld [vmem:[#allocation5 + $0x58] sm:$0xff] }
  0x1e   :  { %239 = vmatpush3.xpose.msra.mxu0 %v66_v0  ;;  %298 = vmatpush3.xpose.msra.mxu1 %v66_v0  ;;  %v47_v4 = vld [vmem:[#allocation2 + $0x20] sm:$0xff]  ;;  %v61_v7 = vld [vmem:[#allocation5 + $0x50] sm:$0xff]  ;;  %v60_v8 = vld [vmem:[#allocation5 + $0x48] sm:$0xff] }
  0x1f   :  { %240 = vmatprep.subr.mxu0 %v65_v1  ;;  %283 = vmatprep.subr.mxu1 %v65_v1  ;;  %v63_v5 = vld [vmem:[#allocation5 + $0x60] sm:$0xff]  ;;  %v58_v10 = vld [vmem:[#allocation5 + $0x38] sm:$0xff]  ;;  %v57_v11 = vld [vmem:[#allocation5 + $0x30] sm:$0xff] }
  0x20   :  { %270 = vmatprep.mubr.f32.mxu0 %v43_v3  ;;  %276 = vmatprep.mubr.f32.mxu1 %v47_v4  ;;  %v59_v9 = vld [vmem:[#allocation5 + $0x40] sm:$0xff]  ;;  %v56_v12 = vld [vmem:[#allocation5 + $0x28] sm:$0xff]  ;;  %v54_v14 = vld [vmem:[#allocation5 + $0x18] sm:$0xff] }
  0x21   :  { %v55_v13 = vld [vmem:[#allocation5 + $0x20] sm:$0xff]  ;;  %v53_v15 = vld [vmem:[#allocation5 + $0x10] sm:$0xff]  ;;  %v52_v16 = vld [vmem:[#allocation5 + $0x8] sm:$0xff] }
  0x22   :  { %241 = vmatpush3.xpose.msra.mxu0 %v65_v1  ;;  %299 = vmatpush3.xpose.msra.mxu1 %v65_v1  ;;  %v51_v17 = vld [vmem:[#allocation5] sm:$0xff]  ;;  %v44_v18 = vld [vmem:[#allocation2 + $0x8] sm:$0xff]  ;;  %v45_v20 = vld [vmem:[#allocation2 + $0x10] sm:$0xff] }
  0x23   :  { %242 = vmatprep.subr.mxu0 %v64_v2  ;;  %284 = vmatprep.subr.mxu1 %v64_v2  ;;  %v48_v19 = vld [vmem:[#allocation2 + $0x28] sm:$0xff]  ;;  %v49_v21 = vld [vmem:[#allocation2 + $0x30] sm:$0xff]  ;;  %v46_v22 = vld [vmem:[#allocation2 + $0x18] sm:$0xff] }
  0x24   :  { %v50_v23 = vld [vmem:[#allocation2 + $0x38] sm:$0xff]  ;;  %v213_v24 = vld [vmem:[%s433_s2] ss:$0 sm:$0xff]  ;;  %s389_s2 = smov [#allocation7]  }
  0x25   :  { %s200_s24 = sshll.u32 %s389_s2, 4  ;;  %s201_s24 = int_to_ptr.vmem [resolvable:$true] %s200_s24 }
  0x26   :  { %243 = vmatpush3.xpose.msra.mxu0 %v64_v2  ;;  %300 = vmatpush3.xpose.msra.mxu1 %v64_v2  ;;  %s359_s25 = scalar_lea.vmem %s201_s24, 1024  ;;  %p364_p11 = scmp.lt.s32.totalorder %s201_s24, %s201_s24 }
  0x27   :  { %244 = vmatprep.subr.mxu0 %v63_v5  ;;  %285 = vmatprep.subr.mxu1 %v63_v5  ;;  %p360_p10 = scmp.ne.s32.totalorder %s201_s24, %s359_s25  ;;  %p365_p12 = scmp.lt.s32.totalorder %s359_s25, %s359_s25 }
  0x29   :  { %p366_p13 = por %p365_p12, %p364_p11 }
  0x2a   :  { %245 = vmatpush3.xpose.msra.mxu0 %v63_v5  ;;  %301 = vmatpush3.xpose.msra.mxu1 %v63_v5 }
  0x2b   :  { %246 = vmatprep.subr.mxu0 %v62_v6  ;;  %286 = vmatprep.subr.mxu1 %v62_v6  ;;  %p367_p0 = pnand %p366_p13, %p360_p10 }
  0x2e   :  { %247 = vmatpush3.xpose.msra.mxu0 %v62_v6  ;;  %302 = vmatpush3.xpose.msra.mxu1 %v62_v6 }
  0x2f   :  { %248 = vmatprep.subr.mxu0 %v61_v7  ;;  %287 = vmatprep.subr.mxu1 %v61_v7 }
  0x32   :  { %249 = vmatpush3.xpose.msra.mxu0 %v61_v7  ;;  %303 = vmatpush3.xpose.msra.mxu1 %v61_v7 }
  0x33   :  { %250 = vmatprep.subr.mxu0 %v60_v8  ;;  %288 = vmatprep.subr.mxu1 %v60_v8 }
  0x36   :  { %251 = vmatpush3.xpose.msra.mxu0 %v60_v8  ;;  %304 = vmatpush3.xpose.msra.mxu1 %v60_v8 }
  0x37   :  { %252 = vmatprep.subr.mxu0 %v59_v9  ;;  %289 = vmatprep.subr.mxu1 %v59_v9 }
  0x3a   :  { %253 = vmatpush3.xpose.msra.mxu0 %v59_v9  ;;  %305 = vmatpush3.xpose.msra.mxu1 %v59_v9 }
  0x3b   :  { %254 = vmatprep.subr.mxu0 %v58_v10  ;;  %290 = vmatprep.subr.mxu1 %v58_v10 }
  0x3e   :  { %255 = vmatpush3.xpose.msra.mxu0 %v58_v10  ;;  %306 = vmatpush3.xpose.msra.mxu1 %v58_v10 }
  0x3f   :  { %256 = vmatprep.subr.mxu0 %v57_v11  ;;  %291 = vmatprep.subr.mxu1 %v57_v11 }
  0x42   :  { %257 = vmatpush3.xpose.msra.mxu0 %v57_v11  ;;  %307 = vmatpush3.xpose.msra.mxu1 %v57_v11 }
  0x43   :  { %258 = vmatprep.subr.mxu0 %v56_v12  ;;  %292 = vmatprep.subr.mxu1 %v56_v12 }
  0x46   :  { %259 = vmatpush3.xpose.msra.mxu0 %v56_v12  ;;  %308 = vmatpush3.xpose.msra.mxu1 %v56_v12 }
  0x47   :  { %260 = vmatprep.subr.mxu0 %v55_v13  ;;  %293 = vmatprep.subr.mxu1 %v55_v13 }
  0x4a   :  { %261 = vmatpush3.xpose.msra.mxu0 %v55_v13  ;;  %309 = vmatpush3.xpose.msra.mxu1 %v55_v13 }
  0x4b   :  { %262 = vmatprep.subr.mxu0 %v54_v14  ;;  %294 = vmatprep.subr.mxu1 %v54_v14 }
  0x4e   :  { %263 = vmatpush3.xpose.msra.mxu0 %v54_v14  ;;  %310 = vmatpush3.xpose.msra.mxu1 %v54_v14 }
  0x4f   :  { %264 = vmatprep.subr.mxu0 %v53_v15  ;;  %295 = vmatprep.subr.mxu1 %v53_v15 }
  0x52   :  { %265 = vmatpush3.xpose.msra.mxu0 %v53_v15  ;;  %311 = vmatpush3.xpose.msra.mxu1 %v53_v15 }
  0x53   :  { %266 = vmatprep.subr.mxu0 %v52_v16  ;;  %296 = vmatprep.subr.mxu1 %v52_v16 }
  0x56   :  { %267 = vmatpush3.xpose.msra.mxu0 %v52_v16  ;;  %312 = vmatpush3.xpose.msra.mxu1 %v52_v16 }
  0x57   :  { %268 = vmatprep.subr.mxu0 %v51_v17  ;;  %297 = vmatprep.subr.mxu1 %v51_v17 }
  0x5a   :  { %269 = vmatpush3.xpose.msra.mxu0 %v51_v17  ;;  %313 = vmatpush3.xpose.msra.mxu1 %v51_v17 }
  0x5d   :  { %271 = vmatmul.mubr.f32.vlgmr.msra.gmra.mxu0 %v44_v18  ;;  %277 = vmatmul.mubr.f32.vlgmr.msra.gmra.mxu1 %v48_v19 }
  0x5e   :  { %273 = vmatprep.mubr.f32.mxu0 %v45_v20  ;;  %279 = vmatprep.mubr.f32.mxu1 %v49_v21 }
  0x61   :  { %274 = vmatmul.mubr.f32.gmra.mxu0 %v46_v22  ;;  %280 = vmatmul.mubr.f32.gmra.mxu1 %v50_v23 }
 0x11d   :  { %v272_v25 = vpop.f32.mrf.mxu0  ;;  %v278_v26 = vpop.f32.mrf.mxu1 }
 0x11e   :  { %v146_v27 = vadd.f32 %v272_v25, %v213_v24  ;;  %v166_v28 = vadd.f32 %v278_v26, %v213_v24 }
 0x11f   :  { %v140_v29 = vpop.f32.mrf.mxu0  ;;  %v160_v30 = vpop.f32.mrf.mxu1 }
 0x120   :  { %v180_v31 = vmax.f32 %v146_v27, 0.0  ;;  %v184_v32 = vmax.f32 %v166_v28, 0.0  ;;  %v141_v33 = vadd.f32 %v213_v24, %v140_v29  ;;  %v161_v34 = vadd.f32 %v213_v24, %v160_v30 }
 0x121   :  { %v275_v35 = vpop.f32.mrf.mxu0  ;;  %v281_v36 = vpop.f32.mrf.mxu1 }
 0x122   :  { %188 = vst [vmem:[#allocation7 + $0x8] sm:$0xff] %v180_v31  ;;  %192 = vst [vmem:[#allocation7 + $0x28] sm:$0xff] %v184_v32  ;;  %v179_v37 = vmax.f32 %v141_v33, 0.0  ;;  %v183_v38 = vmax.f32 %v161_v34, 0.0  ;;  %v156_v39 = vadd.f32 %v275_v35, %v213_v24  ;;  %v176_v40 = vadd.f32 %v281_v36, %v213_v24 }
 0x123   :  { %v150_v41 = vpop.f32.mrf.mxu0  ;;  %v170_v42 = vpop.f32.mrf.mxu1 }
 0x124   :  { %187 = vst [vmem:[#allocation7] sm:$0xff] %v179_v37  ;;  %191 = vst [vmem:[#allocation7 + $0x20] sm:$0xff] %v183_v38  ;;  %v182_v43 = vmax.f32 %v156_v39, 0.0  ;;  %v186_v44 = vmax.f32 %v176_v40, 0.0  ;;  %v151_v45 = vadd.f32 %v213_v24, %v150_v41  ;;  %v171_v46 = vadd.f32 %v213_v24, %v170_v42 }
 0x126   :  { %190 = vst [vmem:[#allocation7 + $0x18] sm:$0xff] %v182_v43  ;;  %194 = vst [vmem:[#allocation7 + $0x38] sm:$0xff] %v186_v44  ;;  %v181_v47 = vmax.f32 %v151_v45, 0.0  ;;  %v185_v48 = vmax.f32 %v171_v46, 0.0 }
 0x128   :  { %189 = vst [vmem:[#allocation7 + $0x10] sm:$0xff] %v181_v47  ;;  %193 = vst [vmem:[#allocation7 + $0x30] sm:$0xff] %v185_v48 }
 0x129   :  { %370 = shalt.err (!%p367_p0)
}
 0x12a   :  { %206 = dma.vmem_to_hbm [thread:$0]  %s201_s24, 1024, %s434_s3, [#allocation4], %s386_s15, %s386_s15, %s387_s16  }
 0x12b   :  { %383 = dma.done.wait [#allocation4], 1024  }
 0x12c   :  { %384 = vsyncadd [#allocation4], 4294966272 }
 0x12d   :  { %210 = vsyncpa [#allocation3], 1 }
 0x12e   :  { %211 = vsyncpa [#allocation6], 1 }
 0x12f   :  { %212 = vsyncpa [#allocation4], 1 }

</bundles_post_ra>
